<compile_context>
chip_gen: v7x
topology: tpu7x:2x2x1
jax: 0.10.0
libtpu: 0.0.40
codegen_flags: <defaults>
</compile_context>

<pallas_src>
import functools
import math

import numpy as np
import jax
import jax.numpy as jnp
from jax.experimental import pallas as pl
from jax.experimental.pallas import tpu as pltpu


def _round_up(x: int, m: int) -> int:
    return (x + m - 1) // m * m


def _trend_basis_kernel(theta_ref, wf_ref, wb_ref, fore_ref, back_ref):
    # theta_ref: [rows, pack*2P]   packed batch tile (lane-dense)
    # wf_ref:    [pack*2P, pack*Tf]  block-diag forecast basis (VMEM resident)
    # wb_ref:    [pack*2P, pack*Tb]  block-diag backcast basis (VMEM resident)
    # fore_ref:  [rows, pack*Tf]   packed forecast tile
    # back_ref:  [rows, pack*Tb]   packed backcast tile
    th = theta_ref[...]
    fore_ref[...] = jnp.dot(
        th, wf_ref[...], preferred_element_type=jnp.float32
    ).astype(fore_ref.dtype)
    back_ref[...] = jnp.dot(
        th, wb_ref[...], preferred_element_type=jnp.float32
    ).astype(back_ref.dtype)


def make_trend_basis_params(degree_of_polynomial: int,
                            backcast_size: int,
                            forecast_size: int):
    """Deterministic parameter construction, mirroring the PyTorch __init__."""
    P = degree_of_polynomial + 1
    backcast_time = np.concatenate(
        [np.power(np.arange(backcast_size, dtype=np.float64) / backcast_size, i)[None, :]
         for i in range(P)]).astype(np.float32)            # [P, Tb]
    forecast_time = np.concatenate(
        [np.power(np.arange(forecast_size, dtype=np.float64) / forecast_size, i)[None, :]
         for i in range(P)]).astype(np.float32)            # [P, Tf]
    return jnp.asarray(backcast_time), jnp.asarray(forecast_time)


def _packing_factor(twoP: int, Tf: int, Tb: int) -> int:
    """Smallest `pack` such that pack*2P, pack*Tf, pack*Tb are multiples of 128."""
    def need(n: int) -> int:
        return 128 // math.gcd(n, 128)
    return math.lcm(need(twoP), need(Tf), need(Tb))


@functools.partial(jax.jit, static_argnames=("tm",))
def trend_basis_forward(theta, backcast_time, forecast_time, *, tm: int = 32768):
    """theta: [B, 2P] (forecast coeffs in [:, :P], backcast coeffs in [:, P:]).

    Returns (backcast [B, Tb], forecast [B, Tf]) — same as the PyTorch module.
    """
    B, twoP = theta.shape
    P, Tb = backcast_time.shape
    Pf, Tf = forecast_time.shape
    assert twoP == 2 * P and Pf == P, "theta last dim must be 2 * polynomial_size"

    pack = _packing_factor(twoP, Tf, Tb)      # batch rows packed per lane-row
    row_align = 8 * pack                      # batch-tile granularity (sublane*pack)

    # Per-batch-row maps (theta row = [forecast coeffs (P), backcast coeffs (P)]).
    Mf = jnp.concatenate(
        [forecast_time.astype(jnp.float32), jnp.zeros((P, Tf), jnp.float32)], axis=0)  # [2P, Tf]
    Mb = jnp.concatenate(
        [jnp.zeros((P, Tb), jnp.float32), backcast_time.astype(jnp.float32)], axis=0)  # [2P, Tb]
    eye = jnp.eye(pack, dtype=jnp.float32)
    Wf = jnp.kron(eye, Mf)                    # [pack*2P, pack*Tf]
    Wb = jnp.kron(eye, Mb)                    # [pack*2P, pack*Tb]

    # Balanced batch tiling; >= 2 grid steps when possible (v7x megacore).
    ntiles = max(1, -(-B // tm))
    if ntiles == 1 and B > row_align:
        ntiles = 2
    tile = _round_up(-(-B // ntiles), row_align)
    Bp = _round_up(B, tile)
    steps = Bp // tile
    rows = tile // pack                       # packed rows per grid step (mult of 8)

    theta_p = theta.astype(jnp.float32)
    if Bp != B:
        theta_p = jnp.pad(theta_p, ((0, Bp - B), (0, 0)))
    theta_packed = theta_p.reshape(Bp // pack, pack * twoP)   # free row-major reshape

    fore_pk, back_pk = pl.pallas_call(
        _trend_basis_kernel,
        out_shape=(
            jax.ShapeDtypeStruct((Bp // pack, pack * Tf), jnp.float32),
            jax.ShapeDtypeStruct((Bp // pack, pack * Tb), jnp.float32),
        ),
        grid_spec=pltpu.PrefetchScalarGridSpec(
            num_scalar_prefetch=0,
            grid=(steps,),
            in_specs=[
                pl.BlockSpec((rows, pack * twoP), lambda i: (i, 0)),   # streamed theta
                pl.BlockSpec((pack * twoP, pack * Tf), lambda i: (0, 0)),  # resident Wf
                pl.BlockSpec((pack * twoP, pack * Tb), lambda i: (0, 0)),  # resident Wb
            ],
            out_specs=[
                pl.BlockSpec((rows, pack * Tf), lambda i: (i, 0)),
                pl.BlockSpec((rows, pack * Tb), lambda i: (i, 0)),
            ],
        ),
        compiler_params=pltpu.CompilerParams(
            dimension_semantics=("parallel",),   # shard batch tiles across TCs (v7x)
        ),
    )(theta_packed, Wf, Wb)

    forecast = fore_pk.reshape(Bp, Tf)        # free reshape back to module layout
    backcast = back_pk.reshape(Bp, Tb)
    if Bp != B:                               # slice only when padding was needed
        forecast = forecast[:B]
        backcast = backcast[:B]
    return backcast, forecast


def _reference(theta, backcast_time, forecast_time):
    P = backcast_time.shape[0]
    ref_back = jnp.einsum('bp,pt->bt', theta[:, P:], backcast_time)
    ref_fore = jnp.einsum('bp,pt->bt', theta[:, :P], forecast_time)
    return ref_back, ref_fore


if __name__ == "__main__":
    # Small, forward-consistent shapes (matches the PyTorch module semantics).
    degree_of_polynomial = 3          # -> polynomial_size P = 4
    backcast_size = 16
    forecast_size = 8
    batch = 2
    P = degree_of_polynomial + 1

    backcast_time, forecast_time = make_trend_basis_params(
        degree_of_polynomial, backcast_size, forecast_size)

    key = jax.random.PRNGKey(0)
    theta = jax.random.normal(key, (batch, 2 * P), dtype=jnp.float32)

    backcast, forecast = trend_basis_forward(theta, backcast_time, forecast_time)
    backcast = jax.block_until_ready(backcast)
    forecast = jax.block_until_ready(forecast)

    ref_back, ref_fore = _reference(theta, backcast_time, forecast_time)
    assert backcast.shape == (batch, backcast_size)
    assert forecast.shape == (batch, forecast_size)
    np.testing.assert_allclose(np.asarray(backcast), np.asarray(ref_back),
                               rtol=1e-5, atol=1e-5)
    np.testing.assert_allclose(np.asarray(forecast), np.asarray(ref_fore),
                               rtol=1e-5, atol=1e-5)

    # Multi-step grid (grid=(4,)) with an exactly-aligned batch (no pad/slice).
    theta_big = jax.random.normal(jax.random.PRNGKey(1), (512, 2 * P), jnp.float32)
    bc_big, fc_big = trend_basis_forward(theta_big, backcast_time, forecast_time, tm=128)
    bc_big = jax.block_until_ready(bc_big)
    fc_big = jax.block_until_ready(fc_big)
    ref_bc_big, ref_fc_big = _reference(theta_big, backcast_time, forecast_time)
    np.testing.assert_allclose(np.asarray(bc_big), np.asarray(ref_bc_big),
                               rtol=1e-5, atol=1e-5)
    np.testing.assert_allclose(np.asarray(fc_big), np.asarray(ref_fc_big),
                               rtol=1e-5, atol=1e-5)

    # Non-aligned batch: exercises balanced tiling + pad + final slice path.
    theta_odd = jax.random.normal(jax.random.PRNGKey(2), (300, 2 * P), jnp.float32)
    bc_odd, fc_odd = trend_basis_forward(theta_odd, backcast_time, forecast_time)
    bc_odd = jax.block_until_ready(bc_odd)
    fc_odd = jax.block_until_ready(fc_odd)
    ref_bc_odd, ref_fc_odd = _reference(theta_odd, backcast_time, forecast_time)
    assert bc_odd.shape == (300, backcast_size) and fc_odd.shape == (300, forecast_size)
    np.testing.assert_allclose(np.asarray(bc_odd), np.asarray(ref_bc_odd),
                               rtol=1e-5, atol=1e-5)
    np.testing.assert_allclose(np.asarray(fc_odd), np.asarray(ref_fc_odd),
                               rtol=1e-5, atol=1e-5)

    print("KERNEL_OK")
</pallas_src>

<mosaic_0001>
module attributes {stable_mosaic.version = 11 : i64} {
  func.func @_trend_basis_kernel(%arg0: i32, %arg1: memref<8x128xf32, #tpu.memory_space<vmem>>, %arg2: memref<128x128xf32, #tpu.memory_space<vmem>>, %arg3: memref<128x256xf32, #tpu.memory_space<vmem>>, %arg4: memref<8x128xf32, #tpu.memory_space<vmem>>, %arg5: memref<8x256xf32, #tpu.memory_space<vmem>>) attributes {dimension_semantics = [#tpu.dimension_semantics<parallel>], iteration_bounds = array<i64: 1>, scalar_prefetch = 0 : i64, scratch_operands = 0 : i64, tpu.core_type = #tpu.core_type<tc>, window_params = [{transform_indices = @transform_0, window_bounds = array<i64: 8, 128>}, {pipeline_mode = #tpu.pipeline_mode<synchronous>, transform_indices = @transform_1, window_bounds = array<i64: 128, 128>}, {pipeline_mode = #tpu.pipeline_mode<synchronous>, transform_indices = @transform_2, window_bounds = array<i64: 128, 256>}, {transform_indices = @transform_3, window_bounds = array<i64: 8, 128>}, {transform_indices = @transform_4, window_bounds = array<i64: 8, 256>}]} {
    %c0 = arith.constant 0 : index
    %c0_0 = arith.constant 0 : index
    %0 = vector.load %arg1[%c0, %c0_0] : memref<8x128xf32, #tpu.memory_space<vmem>>, vector<8x128xf32>
    %c0_1 = arith.constant 0 : index
    %c0_2 = arith.constant 0 : index
    %1 = vector.load %arg2[%c0_1, %c0_2] : memref<128x128xf32, #tpu.memory_space<vmem>>, vector<128x128xf32>
    %cst = arith.constant dense<0.000000e+00> : vector<8x128xf32>
    %2 = tpu.matmul %0, %1, %cst {dimension_numbers = #tpu.dot_dimension_numbers<[1], [0], [0], [1], [0, 0, 1, 1], [], []>} : vector<8x128xf32>, vector<128x128xf32>, vector<8x128xf32> -> vector<8x128xf32>
    %c0_3 = arith.constant 0 : index
    %c0_4 = arith.constant 0 : index
    %3 = vector.load %arg4[%c0_3, %c0_4] : memref<8x128xf32, #tpu.memory_space<vmem>>, vector<8x128xf32>
    tpu.vector_store %arg4[%c0_3, %c0_4], %2 {strides = array<i32>} : memref<8x128xf32, #tpu.memory_space<vmem>>, vector<8x128xf32>,
    %c0_5 = arith.constant 0 : index
    %c0_6 = arith.constant 0 : index
    %4 = vector.load %arg3[%c0_5, %c0_6] : memref<128x256xf32, #tpu.memory_space<vmem>>, vector<128x256xf32>
    %cst_7 = arith.constant dense<0.000000e+00> : vector<8x256xf32>
    %5 = tpu.matmul %0, %4, %cst_7 {dimension_numbers = #tpu.dot_dimension_numbers<[1], [0], [0], [1], [0, 0, 1, 1], [], []>} : vector<8x128xf32>, vector<128x256xf32>, vector<8x256xf32> -> vector<8x256xf32>
    %c0_8 = arith.constant 0 : index
    %c0_9 = arith.constant 0 : index
    %6 = vector.load %arg5[%c0_8, %c0_9] : memref<8x256xf32, #tpu.memory_space<vmem>>, vector<8x256xf32>
    tpu.vector_store %arg5[%c0_8, %c0_9], %5 {strides = array<i32>} : memref<8x256xf32, #tpu.memory_space<vmem>>, vector<8x256xf32>,
    return
  }
  func.func @transform_0(%arg0: i32) -> (i32, i32) {
    %c0_i32 = arith.constant 0 : i32
    %c0_i32_0 = arith.constant 0 : i32
    return %arg0, %c0_i32 : i32, i32
  }
  func.func @transform_1(%arg0: i32) -> (i32, i32) {
    %c0_i32 = arith.constant 0 : i32
    %c0_i32_0 = arith.constant 0 : i32
    %c0_i32_1 = arith.constant 0 : i32
    return %c0_i32, %c0_i32_0 : i32, i32
  }
  func.func @transform_2(%arg0: i32) -> (i32, i32) {
    %c0_i32 = arith.constant 0 : i32
    %c0_i32_0 = arith.constant 0 : i32
    %c0_i32_1 = arith.constant 0 : i32
    return %c0_i32, %c0_i32_0 : i32, i32
  }
  func.func @transform_3(%arg0: i32) -> (i32, i32) {
    %c0_i32 = arith.constant 0 : i32
    %c0_i32_0 = arith.constant 0 : i32
    return %arg0, %c0_i32 : i32, i32
  }
  func.func @transform_4(%arg0: i32) -> (i32, i32) {
    %c0_i32 = arith.constant 0 : i32
    %c0_i32_0 = arith.constant 0 : i32
    return %arg0, %c0_i32 : i32, i32
  }
}

</mosaic_0001>

<bundles_post_ra>
// kernel: trend_basis_forward.1
= control target key start
LH: loop header
LB: loop body
LE: loop exit
PB: predicated region body
PF: predicated region fallthrough
CT: control target
= control target key end

     0   :  { %v328_v0 = vmov 0.0|0.0   ;;  %vm329_vm0 = vmmov 0   ;;  %v330_v4 = vmov 0.0   ;;  %s520_s2 = inlined_call_operand.vmem [shape: f32[128,256], index: 2, kind: input, shape index: {}]   ;;  %s521_s1 = inlined_call_operand.vmem [shape: f32[128,128], index: 1, kind: input, shape index: {}]   ;;  %s522_s0 = inlined_call_operand.vmem [shape: f32[8,128], index: 0, kind: input, shape index: {}]   ;;  %s523_s3 = inlined_call_operand.vmem [shape: f32[8,128], index: 3, kind: output, shape index: {0}]   ;;  %s524_s4 = inlined_call_operand.vmem [shape: f32[8,256], index: 4, kind: output, shape index: {1}]  }
   0x1   :  { %269 = vmatprep.subr.bf16.mxu0 %v328_v0  ;;  %v105_v1 = vld [vmem:[%s520_s2 + $0x8] sm:$0xff]  ;;  %v107_v2 = vld [vmem:[%s520_s2 + $0x18] sm:$0xff]  ;;  %v17_v3 = vld [vmem:[%s521_s1] sm:$0xff]  ;;  %266 = vmatprep.mubr.msk.f32.mxu0 %vm329_vm0, %v330_v4 }
   0x2   :  { %v293_v5 = vpack.c.bf16 %v107_v2, %v105_v1  ;;  %v18_v6 = vld [vmem:[%s521_s1 + $0x8] sm:$0xff]  ;;  %v104_v7 = vld [vmem:[%s520_s2] sm:$0xff]  ;;  %v106_v8 = vld [vmem:[%s520_s2 + $0x10] sm:$0xff]  ;;  %200 = vmatprep.mubr.f32.mxu1 %v330_v4 }
   0x3   :  { %v270_v9 = vpack.c.bf16 %v18_v6, %v17_v3  ;;  %v295_v10 = vpack.c.bf16 %v106_v8, %v104_v7  ;;  %v109_v11 = vld [vmem:[%s520_s2 + $0x28] sm:$0xff]  ;;  %v111_v12 = vld [vmem:[%s520_s2 + $0x38] sm:$0xff]  ;;  %v19_v13 = vld [vmem:[%s521_s1 + $0x10] sm:$0xff] }
   0x4   :  { %294 = vmatprep.subr.bf16.mxu1 %v293_v5  ;;  %v297_v14 = vpack.c.bf16 %v111_v12, %v109_v11  ;;  %v20_v15 = vld [vmem:[%s521_s1 + $0x18] sm:$0xff]  ;;  %v108_v16 = vld [vmem:[%s520_s2 + $0x20] sm:$0xff]  ;;  %v110_v17 = vld [vmem:[%s520_s2 + $0x30] sm:$0xff] }
   0x5   :  { %271 = vmatpush3.bf16.msra.mxu0 %v270_v9  ;;  %296 = vmatpush1.bf16.msra.mxu1 %v295_v10  ;;  %v273_v18 = vpack.c.bf16 %v20_v15, %v19_v13  ;;  %v299_v19 = vpack.c.bf16 %v110_v17, %v108_v16  ;;  %v113_v20 = vld [vmem:[%s520_s2 + $0x48] sm:$0xff]  ;;  %v115_v21 = vld [vmem:[%s520_s2 + $0x58] sm:$0xff]  ;;  %v21_v22 = vld [vmem:[%s521_s1 + $0x20] sm:$0xff] }
   0x6   :  { %272 = vmatprep.subr.bf16.mxu0 %v328_v0  ;;  %298 = vmatprep.subr.bf16.mxu1 %v297_v14  ;;  %v301_v23 = vpack.c.bf16 %v115_v21, %v113_v20  ;;  %v22_v24 = vld [vmem:[%s521_s1 + $0x28] sm:$0xff]  ;;  %v112_v25 = vld [vmem:[%s520_s2 + $0x40] sm:$0xff]  ;;  %v114_v26 = vld [vmem:[%s520_s2 + $0x50] sm:$0xff] }
   0x7   :  { %v117_v27 = vld [vmem:[%s520_s2 + $0x68] sm:$0xff]  ;;  %v119_v28 = vld [vmem:[%s520_s2 + $0x78] sm:$0xff]  ;;  %v276_v29 = vpack.c.bf16 %v22_v24, %v21_v22  ;;  %v303_v30 = vpack.c.bf16 %v114_v26, %v112_v25  ;;  %v23_v31 = vld [vmem:[%s521_s1 + $0x30] sm:$0xff] }
   0x8   :  { %v305_v32 = vpack.c.bf16 %v119_v28, %v117_v27  ;;  %v24_v33 = vld [vmem:[%s521_s1 + $0x38] sm:$0xff]  ;;  %v116_v34 = vld [vmem:[%s520_s2 + $0x60] sm:$0xff]  ;;  %v118_v35 = vld [vmem:[%s520_s2 + $0x70] sm:$0xff] }
   0x9   :  { %274 = vmatpush3.bf16.msra.mxu0 %v273_v18  ;;  %300 = vmatpush1.bf16.msra.mxu1 %v299_v19  ;;  %v121_v36 = vld [vmem:[%s520_s2 + $0x88] sm:$0xff]  ;;  %v123_v37 = vld [vmem:[%s520_s2 + $0x98] sm:$0xff]  ;;  %v279_v38 = vpack.c.bf16 %v24_v33, %v23_v31  ;;  %v307_v39 = vpack.c.bf16 %v118_v35, %v116_v34  ;;  %v25_v40 = vld [vmem:[%s521_s1 + $0x40] sm:$0xff] }
   0xa   :  { %275 = vmatprep.subr.bf16.mxu0 %v328_v0  ;;  %302 = vmatprep.subr.bf16.mxu1 %v301_v23  ;;  %v309_v41 = vpack.c.bf16 %v123_v37, %v121_v36  ;;  %v26_v42 = vld [vmem:[%s521_s1 + $0x48] sm:$0xff]  ;;  %v120_v43 = vld [vmem:[%s520_s2 + $0x80] sm:$0xff]  ;;  %v122_v44 = vld [vmem:[%s520_s2 + $0x90] sm:$0xff] }
   0xb   :  { %v125_v45 = vld [vmem:[%s520_s2 + $0xa8] sm:$0xff]  ;;  %v127_v46 = vld [vmem:[%s520_s2 + $0xb8] sm:$0xff]  ;;  %v282_v47 = vpack.c.bf16 %v26_v42, %v25_v40  ;;  %v311_v48 = vpack.c.bf16 %v122_v44, %v120_v43  ;;  %v27_v49 = vld [vmem:[%s521_s1 + $0x50] sm:$0xff] }
   0xc   :  { %v313_v50 = vpack.c.bf16 %v127_v46, %v125_v45  ;;  %v28_v51 = vld [vmem:[%s521_s1 + $0x58] sm:$0xff]  ;;  %v124_v52 = vld [vmem:[%s520_s2 + $0xa0] sm:$0xff]  ;;  %v126_v53 = vld [vmem:[%s520_s2 + $0xb0] sm:$0xff] }
   0xd   :  { %277 = vmatpush3.bf16.msra.mxu0 %v276_v29  ;;  %304 = vmatpush1.bf16.msra.mxu1 %v303_v30  ;;  %v129_v54 = vld [vmem:[%s520_s2 + $0xc8] sm:$0xff]  ;;  %v131_v55 = vld [vmem:[%s520_s2 + $0xd8] sm:$0xff]  ;;  %v285_v56 = vpack.c.bf16 %v28_v51, %v27_v49  ;;  %v315_v57 = vpack.c.bf16 %v126_v53, %v124_v52  ;;  %v29_v58 = vld [vmem:[%s521_s1 + $0x60] sm:$0xff] }
   0xe   :  { %278 = vmatprep.subr.bf16.mxu0 %v328_v0  ;;  %306 = vmatprep.subr.bf16.mxu1 %v305_v32  ;;  %v317_v59 = vpack.c.bf16 %v131_v55, %v129_v54  ;;  %v30_v60 = vld [vmem:[%s521_s1 + $0x68] sm:$0xff]  ;;  %v128_v61 = vld [vmem:[%s520_s2 + $0xc0] sm:$0xff]  ;;  %v130_v62 = vld [vmem:[%s520_s2 + $0xd0] sm:$0xff] }
   0xf   :  { %v133_v63 = vld [vmem:[%s520_s2 + $0xe8] sm:$0xff]  ;;  %v135_v1 = vld [vmem:[%s520_s2 + $0xf8] sm:$0xff]  ;;  %v288_v2 = vpack.c.bf16 %v30_v60, %v29_v58  ;;  %v319_v3 = vpack.c.bf16 %v130_v62, %v128_v61  ;;  %v31_v4 = vld [vmem:[%s521_s1 + $0x70] sm:$0xff] }
  0x10   :  { %v321_v5 = vpack.c.bf16 %v135_v1, %v133_v63  ;;  %v32_v6 = vld [vmem:[%s521_s1 + $0x78] sm:$0xff]  ;;  %v132_v7 = vld [vmem:[%s520_s2 + $0xe0] sm:$0xff]  ;;  %v134_v8 = vld [vmem:[%s520_s2 + $0xf0] sm:$0xff] }
  0x11   :  { %280 = vmatpush3.bf16.msra.mxu0 %v279_v38  ;;  %308 = vmatpush1.bf16.msra.mxu1 %v307_v39  ;;  %v291_v9 = vpack.c.bf16 %v32_v6, %v31_v4  ;;  %v323_v10 = vpack.c.bf16 %v134_v8, %v132_v7  ;;  %v16_v11 = vld [vmem:[%s522_s0] sm:$0xff] }
  0x12   :  { %281 = vmatprep.subr.bf16.mxu0 %v328_v0  ;;  %310 = vmatprep.subr.bf16.mxu1 %v309_v41 }
  0x15   :  { %283 = vmatpush3.bf16.msra.mxu0 %v282_v47  ;;  %312 = vmatpush1.bf16.msra.mxu1 %v311_v48 }
  0x16   :  { %284 = vmatprep.subr.bf16.mxu0 %v328_v0  ;;  %314 = vmatprep.subr.bf16.mxu1 %v313_v50 }
  0x19   :  { %286 = vmatpush3.bf16.msra.mxu0 %v285_v56  ;;  %316 = vmatpush1.bf16.msra.mxu1 %v315_v57 }
  0x1a   :  { %287 = vmatprep.subr.bf16.mxu0 %v328_v0  ;;  %318 = vmatprep.subr.bf16.mxu1 %v317_v59 }
  0x1d   :  { %289 = vmatpush3.bf16.msra.mxu0 %v288_v2  ;;  %320 = vmatpush1.bf16.msra.mxu1 %v319_v3 }
  0x1e   :  { %290 = vmatprep.subr.bf16.mxu0 %v328_v0  ;;  %322 = vmatprep.subr.bf16.mxu1 %v321_v5 }
  0x21   :  { %292 = vmatpush3.bf16.msra.mxu0 %v291_v9  ;;  %324 = vmatpush1.bf16.msra.mxu1 %v323_v10 }
  0x24   :  { %267 = vmatmul.mubr.f32.vlgmr.msra.gmra.mrb[0].mxu0 %v16_v11  ;;  %201 = vmatmul.mubr.f32.vlgmr.msra.gmra.mrb[0].mxu1 %v16_v11 }
  0xf7   :  { %v99_v12 = vpop.f32.mrb[0].mxu0  ;;  %v202_v13 = vpop.f32.mrb[0].mxu1 }
  0xf8   :  { %103 = vst [vmem:[%s523_s3] sm:$0xff] %v99_v12  ;;  %207 = vst [vmem:[%s524_s4] sm:$0xff] %v202_v13  ;;  %v268_v0 = vpop.f32.mrb[1].mxu0  ;;  %v204_v14 = vpop.f32.mrb[1].mxu1 }
  0xf9   :  { %208 = vst [vmem:[%s524_s4 + $0x8] sm:$0xff] %v204_v14 }

</bundles_post_ra>
